<compile_context>
chip_gen: v7x
topology: tpu7x:2x2x1
jax: 0.10.0
libtpu: 0.0.40
codegen_flags: <defaults>
</compile_context>

<pallas_src>
from functools import partial

import numpy as np
import jax
import jax.numpy as jnp
from jax.experimental import pallas as pl
from jax.experimental.pallas import tpu as pltpu


# ----------------------------------------------------------------------------
# Fused GCN kernel: one grid step processes `nb` batch elements.
# ----------------------------------------------------------------------------
def gcn_kernel(x_ref, a_ref, w_ref, b_ref, o_ref, *, nb):
    w = w_ref[...]                                     # (T*Cin, T*Cout) block-diagonal
    V = a_ref.shape[1]
    lanes = b_ref.shape[1]                             # T*Cout
    bias_b = jnp.broadcast_to(b_ref[...], (V, lanes))  # hoisted (no per-iter broadcast)

    for b in range(nb):                                # tiny static unroll (<= 2)
        a = a_ref[b]                                   # (V, V)
        # D^{-1/2} from row degrees (XLU reduce + EUP rsqrt); matches torch d**-0.5
        # semantics, i.e. inf/NaN on zero-degree rows.
        d = jnp.sum(a, axis=-1, keepdims=True)         # (V, 1)
        dinv = jax.lax.rsqrt(d)                        # (V, 1)

        # out[u, t*Cout+h] = dinv[u] * sum_v A[u,v] * dinv[v] * (X[t] @ W)[v,h] + bias[h]
        s = jnp.dot(x_ref[b], w,
                    preferred_element_type=jnp.float32)       # (V, T*Cout) lane-dense
        agg = jnp.dot(a, dinv * s,
                      preferred_element_type=jnp.float32)     # (V, T*Cout)
        o_ref[b] = (dinv * agg + bias_b).astype(o_ref.dtype)


def _grid_steps(n):
    """2 parallel grid steps only on chips with >1 TensorCore per device."""
    try:
        kind = jax.devices()[0].device_kind.lower()
    except Exception:
        return 1
    multi_tc = any(tag in kind for tag in ("v7", "7x", "v4", "v5p"))
    g = 2 if (multi_tc and n % 2 == 0) else 1
    return max(min(g, n), 1)


def gcn_forward(X, A, weight, bias):
    """X: (N, T, V, Cin), A: (N, V, V), weight: (Cin, Cout), bias: (Cout,)."""
    N, T, V, Cin = X.shape
    Cout = weight.shape[1]

    # Wrapper-side layout plumbing (cheap XLA reshapes/transposes):
    #   X2[n, v, t*Cin + c]         = X[n, t, v, c]
    #   W_bd[t*Cin + c, t*Cout + h] = W[c, h]   (block-diagonal over t)
    #   bias_t[0, t*Cout + h]       = bias[h]
    X2 = X.transpose(0, 2, 1, 3).reshape(N, V, T * Cin)
    W_bd = jnp.kron(jnp.eye(T, dtype=weight.dtype), weight)      # (T*Cin, T*Cout)
    bias_t = jnp.tile(bias, T).reshape(1, T * Cout)

    G = _grid_steps(N)
    NB = N // G

    out_slab = pl.pallas_call(
        partial(gcn_kernel, nb=NB),
        out_shape=jax.ShapeDtypeStruct((N, V, T * Cout), X.dtype),
        grid=(G,),
        in_specs=[
            pl.BlockSpec((NB, V, T * Cin), lambda i: (i, 0, 0)),
            pl.BlockSpec((NB, V, V), lambda i: (i, 0, 0)),
            pl.BlockSpec((T * Cin, T * Cout), lambda i: (0, 0)),
            pl.BlockSpec((1, T * Cout), lambda i: (0, 0)),
        ],
        out_specs=pl.BlockSpec((NB, V, T * Cout), lambda i: (i, 0, 0)),
        compiler_params=pltpu.CompilerParams(
            dimension_semantics=("parallel",)),
    )(X2, A, W_bd, bias_t)

    # (N, V, T*Cout) lane-dense slab -> (N, T, V, Cout)
    return out_slab.reshape(N, V, T, Cout).transpose(0, 2, 1, 3)


# ----------------------------------------------------------------------------
# Pure-JAX reference mirroring the PyTorch forward (for validation).
# ----------------------------------------------------------------------------
def gcn_forward_ref(X, A, weight, bias):
    d = A.sum(-1)                                           # (N, V)
    dinv = jnp.power(d, -0.5)                               # (N, V)
    norm_A = dinv[:, :, None] * A * dinv[:, None, :]        # D^-1/2 A D^-1/2
    support = jnp.einsum("ntvb,bh->ntvh", X, weight, precision="highest")
    out = jnp.einsum("nuv,ntvh->ntuh", norm_A, support, precision="highest")
    return out + bias


# ----------------------------------------------------------------------------
if __name__ == "__main__":
    N, T, V = 2, 4, 16          # batch, time, vertices
    input_dim, output_dim = 8, 32

    key = jax.random.PRNGKey(0)
    kx, ka, kw = jax.random.split(key, 3)
    X = jax.random.normal(kx, (N, T, V, input_dim), jnp.float32)
    # Positive adjacency with self loops so the degree rsqrt is well defined.
    A = jax.random.uniform(ka, (N, V, V), jnp.float32, minval=0.1, maxval=1.0) \
        + jnp.eye(V, dtype=jnp.float32)
    weight = jax.random.normal(kw, (input_dim, output_dim), jnp.float32) * 0.1
    bias = jnp.linspace(-0.5, 0.5, output_dim).astype(jnp.float32)

    out = gcn_forward(X, A, weight, bias)
    out = jax.block_until_ready(out)

    ref = gcn_forward_ref(X, A, weight, bias)
    ref = jax.block_until_ready(ref)

    assert out.shape == (N, T, V, output_dim), out.shape
    np.testing.assert_allclose(np.asarray(out), np.asarray(ref),
                               rtol=1e-3, atol=1e-3)
    print("KERNEL_OK")
</pallas_src>

<mosaic_0001>
module attributes {stable_mosaic.version = 11 : i64} {
  func.func @gcn_kernel(%arg0: i32, %arg1: memref<2x16x32xf32, #tpu.memory_space<vmem>>, %arg2: memref<2x16x16xf32, #tpu.memory_space<vmem>>, %arg3: memref<32x128xf32, #tpu.memory_space<vmem>>, %arg4: memref<1x128xf32, #tpu.memory_space<vmem>>, %arg5: memref<2x16x128xf32, #tpu.memory_space<vmem>>) attributes {dimension_semantics = [#tpu.dimension_semantics<parallel>], iteration_bounds = array<i64: 1>, scalar_prefetch = 0 : i64, scratch_operands = 0 : i64, tpu.core_type = #tpu.core_type<tc>, window_params = [{transform_indices = @transform_0, window_bounds = array<i64: 2, 16, 32>}, {transform_indices = @transform_1, window_bounds = array<i64: 2, 16, 16>}, {pipeline_mode = #tpu.pipeline_mode<synchronous>, transform_indices = @transform_2, window_bounds = array<i64: 32, 128>}, {pipeline_mode = #tpu.pipeline_mode<synchronous>, transform_indices = @transform_3, window_bounds = array<i64: 1, 128>}, {transform_indices = @transform_4, window_bounds = array<i64: 2, 16, 128>}]} {
    %c0 = arith.constant 0 : index
    %c0_0 = arith.constant 0 : index
    %0 = vector.load %arg3[%c0, %c0_0] : memref<32x128xf32, #tpu.memory_space<vmem>>, vector<32x128xf32>
    %c0_1 = arith.constant 0 : index
    %c0_2 = arith.constant 0 : index
    %1 = vector.load %arg4[%c0_1, %c0_2] : memref<1x128xf32, #tpu.memory_space<vmem>>, vector<1x128xf32>
    %2 = vector.shape_cast %1 : vector<1x128xf32> to vector<1x128xf32>
    %3 = vector.broadcast %2 : vector<1x128xf32> to vector<16x128xf32>
    %c0_3 = arith.constant 0 : index
    %c0_4 = arith.constant 0 : index
    %c0_5 = arith.constant 0 : index
    %4 = vector.load %arg2[%c0_3, %c0_4, %c0_5] : memref<2x16x16xf32, #tpu.memory_space<vmem>>, vector<1x16x16xf32>
    %5 = vector.shape_cast %4 : vector<1x16x16xf32> to vector<16x16xf32>
    %cst = arith.constant dense<0.000000e+00> : vector<16xf32>
    %6 = vector.multi_reduction <add>, %5, %cst [1] : vector<16x16xf32> to vector<16xf32>
    %7 = vector.shape_cast %6 : vector<16xf32> to vector<16x1xf32>
    %8 = math.rsqrt %7 : vector<16x1xf32>
    %c0_6 = arith.constant 0 : index
    %c0_7 = arith.constant 0 : index
    %c0_8 = arith.constant 0 : index
    %9 = vector.load %arg1[%c0_6, %c0_7, %c0_8] : memref<2x16x32xf32, #tpu.memory_space<vmem>>, vector<1x16x32xf32>
    %10 = vector.shape_cast %9 : vector<1x16x32xf32> to vector<16x32xf32>
    %cst_9 = arith.constant dense<0.000000e+00> : vector<16x128xf32>
    %11 = tpu.matmul %10, %0, %cst_9 {dimension_numbers = #tpu.dot_dimension_numbers<[1], [0], [0], [1], [0, 0, 1, 1], [], []>} : vector<16x32xf32>, vector<32x128xf32>, vector<16x128xf32> -> vector<16x128xf32>
    %12 = vector.broadcast %8 : vector<16x1xf32> to vector<16x128xf32>
    %13 = arith.mulf %12, %11 : vector<16x128xf32>
    %cst_10 = arith.constant dense<0.000000e+00> : vector<16x128xf32>
    %14 = tpu.matmul %5, %13, %cst_10 {dimension_numbers = #tpu.dot_dimension_numbers<[1], [0], [0], [1], [0, 0, 1, 1], [], []>} : vector<16x16xf32>, vector<16x128xf32>, vector<16x128xf32> -> vector<16x128xf32>
    %15 = vector.broadcast %8 : vector<16x1xf32> to vector<16x128xf32>
    %16 = arith.mulf %15, %14 : vector<16x128xf32>
    %17 = arith.addf %16, %3 : vector<16x128xf32>
    %c0_11 = arith.constant 0 : index
    %c0_12 = arith.constant 0 : index
    %c0_13 = arith.constant 0 : index
    %18 = vector.load %arg5[%c0_11, %c0_12, %c0_13] : memref<2x16x128xf32, #tpu.memory_space<vmem>>, vector<1x16x128xf32>
    %19 = vector.shape_cast %18 : vector<1x16x128xf32> to vector<16x128xf32>
    %20 = vector.shape_cast %17 : vector<16x128xf32> to vector<1x16x128xf32>
    tpu.vector_store %arg5[%c0_11, %c0_12, %c0_13], %20 {strides = array<i32>} : memref<2x16x128xf32, #tpu.memory_space<vmem>>, vector<1x16x128xf32>,
    %c1 = arith.constant 1 : index
    %c0_14 = arith.constant 0 : index
    %c0_15 = arith.constant 0 : index
    %21 = vector.load %arg2[%c1, %c0_14, %c0_15] : memref<2x16x16xf32, #tpu.memory_space<vmem>>, vector<1x16x16xf32>
    %22 = vector.shape_cast %21 : vector<1x16x16xf32> to vector<16x16xf32>
    %cst_16 = arith.constant dense<0.000000e+00> : vector<16xf32>
    %23 = vector.multi_reduction <add>, %22, %cst_16 [1] : vector<16x16xf32> to vector<16xf32>
    %24 = vector.shape_cast %23 : vector<16xf32> to vector<16x1xf32>
    %25 = math.rsqrt %24 : vector<16x1xf32>
    %c1_17 = arith.constant 1 : index
    %c0_18 = arith.constant 0 : index
    %c0_19 = arith.constant 0 : index
    %26 = vector.load %arg1[%c1_17, %c0_18, %c0_19] : memref<2x16x32xf32, #tpu.memory_space<vmem>>, vector<1x16x32xf32>
    %27 = vector.shape_cast %26 : vector<1x16x32xf32> to vector<16x32xf32>
    %cst_20 = arith.constant dense<0.000000e+00> : vector<16x128xf32>
    %28 = tpu.matmul %27, %0, %cst_20 {dimension_numbers = #tpu.dot_dimension_numbers<[1], [0], [0], [1], [0, 0, 1, 1], [], []>} : vector<16x32xf32>, vector<32x128xf32>, vector<16x128xf32> -> vector<16x128xf32>
    %29 = vector.broadcast %25 : vector<16x1xf32> to vector<16x128xf32>
    %30 = arith.mulf %29, %28 : vector<16x128xf32>
    %cst_21 = arith.constant dense<0.000000e+00> : vector<16x128xf32>
    %31 = tpu.matmul %22, %30, %cst_21 {dimension_numbers = #tpu.dot_dimension_numbers<[1], [0], [0], [1], [0, 0, 1, 1], [], []>} : vector<16x16xf32>, vector<16x128xf32>, vector<16x128xf32> -> vector<16x128xf32>
    %32 = vector.broadcast %25 : vector<16x1xf32> to vector<16x128xf32>
    %33 = arith.mulf %32, %31 : vector<16x128xf32>
    %34 = arith.addf %33, %3 : vector<16x128xf32>
    %c1_22 = arith.constant 1 : index
    %c0_23 = arith.constant 0 : index
    %c0_24 = arith.constant 0 : index
    %35 = vector.load %arg5[%c1_22, %c0_23, %c0_24] : memref<2x16x128xf32, #tpu.memory_space<vmem>>, vector<1x16x128xf32>
    %36 = vector.shape_cast %35 : vector<1x16x128xf32> to vector<16x128xf32>
    %37 = vector.shape_cast %34 : vector<16x128xf32> to vector<1x16x128xf32>
    tpu.vector_store %arg5[%c1_22, %c0_23, %c0_24], %37 {strides = array<i32>} : memref<2x16x128xf32, #tpu.memory_space<vmem>>, vector<1x16x128xf32>,
    return
  }
  func.func @transform_0(%arg0: i32) -> (i32, i32, i32) {
    %c0_i32 = arith.constant 0 : i32
    %c0_i32_0 = arith.constant 0 : i32
    %c0_i32_1 = arith.constant 0 : i32
    return %arg0, %c0_i32, %c0_i32_0 : i32, i32, i32
  }
  func.func @transform_1(%arg0: i32) -> (i32, i32, i32) {
    %c0_i32 = arith.constant 0 : i32
    %c0_i32_0 = arith.constant 0 : i32
    %c0_i32_1 = arith.constant 0 : i32
    return %arg0, %c0_i32, %c0_i32_0 : i32, i32, i32
  }
  func.func @transform_2(%arg0: i32) -> (i32, i32) {
    %c0_i32 = arith.constant 0 : i32
    %c0_i32_0 = arith.constant 0 : i32
    %c0_i32_1 = arith.constant 0 : i32
    return %c0_i32, %c0_i32_0 : i32, i32
  }
  func.func @transform_3(%arg0: i32) -> (i32, i32) {
    %c0_i32 = arith.constant 0 : i32
    %c0_i32_0 = arith.constant 0 : i32
    %c0_i32_1 = arith.constant 0 : i32
    return %c0_i32, %c0_i32_0 : i32, i32
  }
  func.func @transform_4(%arg0: i32) -> (i32, i32, i32) {
    %c0_i32 = arith.constant 0 : i32
    %c0_i32_0 = arith.constant 0 : i32
    %c0_i32_1 = arith.constant 0 : i32
    return %arg0, %c0_i32, %c0_i32_0 : i32, i32, i32
  }
}

</mosaic_0001>

<bundles_post_ra>
// kernel: tpu_custom_call.1
= control target key start
LH: loop header
LB: loop body
LE: loop exit
PB: predicated region body
PF: predicated region fallthrough
CT: control target
= control target key end

     0   :  { %9 = vsyncpa [#allocation3], 0  ;;  %s767_s0 = inlined_call_operand.hbm [shape: f32[2,16,32], index: 0, kind: input, shape index: {}]   ;;  %s768_s1 = inlined_call_operand.hbm [shape: f32[2,16,16], index: 1, kind: input, shape index: {}]   ;;  %s769_s2 = inlined_call_operand.hbm [shape: f32[32,128], index: 2, kind: input, shape index: {}]   ;;  %s770_s3 = inlined_call_operand.vmem [shape: f32[1,128], index: 3, kind: input, shape index: {}]   ;;  %s771_s4 = inlined_call_operand.hbm [shape: f32[2,16,128], index: 4, kind: output, shape index: {}]  }
   0x1   :  { %10 = vsyncpa [#allocation6], 0 }
   0x2   :  { %11 = vsyncpa [#allocation4], 0  ;;  %s654_s15 = smov [#allocation5]   ;;  %s655_s17 = smov [#allocation2]  }
   0x3   :  { %s29_s16 = sshll.u32 %s654_s15, 4  ;;  %s17_s18 = sshll.u32 %s655_s17, 4  ;;  %s30_s16 = int_to_ptr.vmem [resolvable:$true] %s29_s16  ;;  %s685_s18 = int_to_ptr.vmem [resolvable:$true] %s17_s18 }
   0x4   :  { %s560_s21 = scalar_lea.hbm %s768_s1, 512 }
   0x5   :  { %p561_p0 = scmp.ne.s32.totalorder %s768_s1, %s560_s21  ;;  %p564_p1 = scmp.lt.u32.totalorder %s560_s21, %s768_s1 }
   0x7   :  { %p566_p2 = pnand %p564_p1, %p561_p0 }
   0x9   :  { %569 = shalt.err (!%p566_p2)
}
   0xa   :  { %s570_s26 = scalar_lea.vmem %s30_s16, 512  ;;  %p575_p4 = scmp.lt.s32.totalorder %s30_s16, %s30_s16 }
   0xb   :  { %p571_p3 = scmp.ne.s32.totalorder %s30_s16, %s570_s26  ;;  %p576_p5 = scmp.lt.s32.totalorder %s570_s26, %s570_s26 }
   0xd   :  { %p577_p6 = por %p576_p5, %p575_p4 }
   0xf   :  { %p578_p7 = pnand %p577_p6, %p571_p3 }
  0x11   :  { %581 = shalt.err (!%p578_p7)
}
  0x12   :  { %s656_s27 = smov 128   ;;  %s657_s28 = smov 8  }
  0x13   :  { %35 = dma.hbm_to_vmem [thread:$0]  %s768_s1, 512, %s30_s16, [#allocation6], %s656_s27, %s656_s27, %s657_s28  }
  0x14   :  { %s582_s7 = scalar_lea.hbm %s767_s0, 512 }
  0x15   :  { %p583_p8 = scmp.ne.s32.totalorder %s767_s0, %s582_s7  ;;  %p586_p9 = scmp.lt.u32.totalorder %s582_s7, %s767_s0 }
  0x17   :  { %p588_p10 = pnand %p586_p9, %p583_p8 }
  0x19   :  { %591 = shalt.err (!%p588_p10)
}
  0x1a   :  { %s592_s12 = scalar_lea.vmem %s685_s18, 512  ;;  %p597_p12 = scmp.lt.s32.totalorder %s685_s18, %s685_s18 }
  0x1b   :  { %p593_p11 = scmp.ne.s32.totalorder %s685_s18, %s592_s12  ;;  %p598_p13 = scmp.lt.s32.totalorder %s592_s12, %s592_s12 }
  0x1d   :  { %p599_p0 = por %p598_p13, %p597_p12 }
  0x1f   :  { %p600_p1 = pnand %p599_p0, %p593_p11 }
  0x21   :  { %603 = shalt.err (!%p600_p1)
}
  0x22   :  { %23 = dma.hbm_to_vmem [thread:$0]  %s767_s0, 512, %s685_s18, [#allocation3], %s656_s27, %s656_s27, %s657_s28  }
  0x23   :  { %s658_s14 = smov [#allocation7]   ;;  %s604_s19 = scalar_lea.hbm %s769_s2, 512 }
  0x24   :  { %s41_s15 = sshll.u32 %s658_s14, 4  ;;  %p605_p2 = scmp.ne.s32.totalorder %s769_s2, %s604_s19  ;;  %s42_s15 = int_to_ptr.vmem [resolvable:$true] %s41_s15 }
  0x25   :  { %p608_p3 = scmp.lt.u32.totalorder %s604_s19, %s769_s2 }
  0x27   :  { %p610_p4 = pnand %p608_p3, %p605_p2 }
  0x29   :  { %613 = shalt.err (!%p610_p4)
}
  0x2a   :  { %s614_s24 = scalar_lea.vmem %s42_s15, 512  ;;  %p619_p6 = scmp.lt.s32.totalorder %s42_s15, %s42_s15 }
  0x2b   :  { %p615_p5 = scmp.ne.s32.totalorder %s42_s15, %s614_s24  ;;  %p620_p7 = scmp.lt.s32.totalorder %s614_s24, %s614_s24 }
  0x2d   :  { %p621_p8 = por %p620_p7, %p619_p6 }
  0x2f   :  { %p622_p9 = pnand %p621_p8, %p615_p5 }
  0x31   :  { %625 = shalt.err (!%p622_p9)
}
  0x32   :  { %47 = dma.hbm_to_vmem [thread:$0]  %s769_s2, 512, %s42_s15, [#allocation6], %s656_s27, %s656_s27, %s657_s28  }
  0x33   :  { %648 = dma.done.wait [#allocation3], 512  }
  0x34   :  { %649 = vsyncadd [#allocation3], 4294966784 }
  0x35   :  { %650 = dma.done.wait [#allocation6], 1024  }
  0x36   :  { %651 = vsyncadd [#allocation6], 4294966272  ;;  %vm83_vm0 = vcmask 261120   ;;  %v59_v0 = vld [vmem:[#allocation7] sm:$0xff]  ;;  %v60_v1 = vld [vmem:[#allocation7 + $0x8] sm:$0xff]  ;;  %vm72_vm1 = vcmask 130048  }
  0x37   :  { %v61_v2 = vld [vmem:[#allocation7 + $0x10] sm:$0xff]  ;;  %v522_v3 = vpack.c.bf16 %v60_v1, %v59_v0  ;;  %v62_v4 = vld [vmem:[#allocation7 + $0x18] sm:$0xff]  ;;  %v81_v5 = vld [vmem:[#allocation2] sm:$0xff] }
  0x38   :  { %v526_v6 = vpack.c.bf16 %v62_v4, %v61_v2  ;;  %494 = vmatprep.mubr.msk.f32.mxu0 %vm83_vm0, %v81_v5  ;;  %v70_v7 = vld [vmem:[#allocation5] sm:$0xff]  ;;  %v71_v8 = vld [vmem:[#allocation5 + $0x8] sm:$0xff]  ;;  %v255_v12 = vld [vmem:[#allocation5 + $0x10] sm:$0xff] }
  0x39   :  { %523 = vmatprep.subr.bf16.mxu0 %v522_v3  ;;  %v73_v9 = vsel %vm72_vm1, %v70_v7, 0.0  ;;  %501 = vmatprep.mubr.msk.f32.mxu1 %vm72_vm1, %v70_v7  ;;  %v76_v10 = vsel %vm72_vm1, %v71_v8, 0.0  ;;  %v82_v11 = vld [vmem:[#allocation2 + $0x8] sm:$0xff]  ;;  %v256_v13 = vld [vmem:[#allocation5 + $0x18] sm:$0xff]  ;;  %v257_v14 = vsel %vm72_vm1, %v255_v12, 0.0  ;;  %v266_v25 = vld [vmem:[#allocation2 + $0x10] sm:$0xff] }
  0x3a   :  { %525 = vmatpush3.bf16.msra.mxu0 %v522_v3  ;;  %74 = vadd.xlane.f32.xlu0 %v73_v9  ;;  %v260_v15 = vsel %vm72_vm1, %v256_v13, 0.0  ;;  %v267_v26 = vld [vmem:[#allocation2 + $0x18] sm:$0xff]  ;;  %v457_v29 = vld [vmem:[%s770_s3] ss:$0 sm:$0xff]  ;;  %s659_s3 = smov [#allocation8]  }
  0x3b   :  { %527 = vmatprep.subr.bf16.mxu0 %v526_v6  ;;  %258 = vadd.xlane.f32.xlu1 %v257_v14  ;;  %s444_s26 = sshll.u32 %s659_s3, 4  ;;  %s445_s26 = int_to_ptr.vmem [resolvable:$true] %s444_s26 }
  0x3c   :  { %s626_s29 = scalar_lea.vmem %s445_s26, 512  ;;  %p631_p11 = scmp.lt.s32.totalorder %s445_s26, %s445_s26 }
  0x3d   :  { %p627_p10 = scmp.ne.s32.totalorder %s445_s26, %s626_s29  ;;  %p632_p12 = scmp.lt.s32.totalorder %s626_s29, %s626_s29 }
  0x3e   :  { %529 = vmatpush3.bf16.msra.mxu0 %v526_v6  ;;  %77 = vadd.xlane.f32.xlu0 %v76_v10 }
  0x3f   :  { %261 = vadd.xlane.f32.xlu1 %v260_v15  ;;  %p633_p13 = por %p632_p12, %p631_p11 }
  0x41   :  { %495 = vmatmul.mubr.msk.f32.vlgmr.msra.gmra.mrb[0].mxu0 %vm83_vm0, %v82_v11  ;;  %p634_p0 = pnand %p633_p13, %p627_p10 }
  0x42   :  { %519 = vmatprep.mubr.msk.f32.mxu0 %vm72_vm1, %v255_v12 }
  0xc7   :  { %v75_v16 = vpop.xlane.xlu0 %74 }
  0xc8   :  { %v259_v27 = vpop.xlane.xlu1 %258 }
  0xcb   :  { %v78_v17 = vpop.xlane.xlu0 %77 }
  0xcc   :  { %552 = vrsqrt.f32 %v78_v17  ;;  %v262_v28 = vpop.xlane.xlu1 %261 }
  0xcd   :  { %554 = vrsqrt.f32 %v75_v16 }
  0xce   :  { %556 = vrsqrt.f32 %v262_v28 }
  0xcf   :  { %558 = vrsqrt.f32 %v259_v27 }
  0xd6   :  { %v553_v18 = vpop.eup %552 }
  0xd7   :  { %v555_v20 = vpop.eup %554 }
  0xd8   :  { %v557_v36 = vpop.eup %556 }
  0xd9   :  { %v559_v38 = vpop.eup %558 }
 0x114   :  { %v496_v19 = vpop.f32.mrb[0].mxu0 }
 0x115   :  { %v166_v21 = vmul.f32 %v553_v18, %v496_v19  ;;  %v156_v22 = vpop.f32.mrb[1].mxu0 }
 0x116   :  { %v165_v23 = vmul.f32 %v555_v20, %v156_v22 }
 0x118   :  { %v530_v24 = vpack.c.bf16 %v166_v21, %v165_v23 }
 0x11a   :  { %531 = vmatprep.subr.bf16.mxu1 %v530_v24 }
 0x11b   :  { %533 = vmatpush3.bf16.msra.mxu1 %v530_v24 }
 0x11c   :  { %535 = vmatprep.subr.bf16.mxu1 %v522_v3 }
 0x11e   :  { %502 = vmatmul.mubr.msk.f32.vlgmr.msra.gmra.mrb[0].mxu1 %vm72_vm1, %v71_v8 }
 0x11f   :  { %537 = vmatpush3.bf16.msra.mxu1 %v522_v3  ;;  %512 = vmatprep.mubr.msk.f32.mxu1 %vm83_vm0, %v266_v25 }
 0x120   :  { %539 = vmatprep.subr.bf16.mxu1 %v526_v6 }
 0x123   :  { %541 = vmatpush3.bf16.msra.mxu1 %v526_v6 }
 0x126   :  { %513 = vmatmul.mubr.msk.f32.vlgmr.msra.gmra.mrb[2].mxu1 %vm83_vm0, %v267_v26 }
 0x1f1   :  { %v503_v30 = vpop.f32.mrb[0].mxu1 }
 0x1f2   :  { %v249_v31 = vmul.f32 %v553_v18, %v503_v30  ;;  %v239_v32 = vpop.f32.mrb[1].mxu1 }
 0x1f3   :  { %v248_v33 = vmul.f32 %v555_v20, %v239_v32 }
 0x1f4   :  { %v251_v34 = vadd.f32 %v457_v29, %v249_v31 }
 0x1f5   :  { %v250_v35 = vadd.f32 %v457_v29, %v248_v33 }
 0x1f6   :  { %253 = vst [vmem:[#allocation8 + $0x8] sm:$0xff] %v251_v34 }
 0x1f7   :  { %252 = vst [vmem:[#allocation8] sm:$0xff] %v250_v35 }
 0x1f9   :  { %v514_v37 = vpop.f32.mrb[2].mxu1 }
 0x1fa   :  { %v350_v39 = vmul.f32 %v557_v36, %v514_v37  ;;  %v340_v40 = vpop.f32.mrb[3].mxu1 }
 0x1fb   :  { %v349_v41 = vmul.f32 %v559_v38, %v340_v40 }
 0x1fd   :  { %v542_v42 = vpack.c.bf16 %v350_v39, %v349_v41 }
 0x1ff   :  { %543 = vmatprep.subr.bf16.mxu0 %v542_v42 }
 0x200   :  { %545 = vmatpush3.bf16.msra.mxu0 %v542_v42 }
 0x203   :  { %520 = vmatmul.mubr.msk.f32.vlgmr.msra.gmra.mrb[2].mxu0 %vm72_vm1, %v256_v13 }
 0x2d6   :  { %v521_v43 = vpop.f32.mrb[2].mxu0 }
 0x2d7   :  { %v433_v44 = vmul.f32 %v557_v36, %v521_v43  ;;  %v423_v45 = vpop.f32.mrb[3].mxu0 }
 0x2d8   :  { %v432_v46 = vmul.f32 %v559_v38, %v423_v45 }
 0x2d9   :  { %v435_v47 = vadd.f32 %v457_v29, %v433_v44 }
 0x2da   :  { %v434_v48 = vadd.f32 %v457_v29, %v432_v46 }
 0x2db   :  { %438 = vst [vmem:[#allocation8 + $0x18] sm:$0xff] %v435_v47 }
 0x2dc   :  { %437 = vst [vmem:[#allocation8 + $0x10] sm:$0xff] %v434_v48 }
 0x2dd   :  { %637 = shalt.err (!%p634_p0)
}
 0x2de   :  { %s638_s6 = scalar_lea.hbm %s771_s4, 512 }
 0x2df   :  { %p639_p1 = scmp.ne.s32.totalorder %s771_s4, %s638_s6  ;;  %p642_p2 = scmp.lt.u32.totalorder %s638_s6, %s771_s4 }
 0x2e1   :  { %p644_p3 = pnand %p642_p2, %p639_p1 }
 0x2e3   :  { %647 = shalt.err (!%p644_p3)
}
 0x2e4   :  { %450 = dma.vmem_to_hbm [thread:$0]  %s445_s26, 512, %s771_s4, [#allocation4], %s656_s27, %s656_s27, %s657_s28  }
 0x2e5   :  { %652 = dma.done.wait [#allocation4], 512  }
 0x2e6   :  { %653 = vsyncadd [#allocation4], 4294966784 }
 0x2e7   :  { %454 = vsyncpa [#allocation3], 1 }
 0x2e8   :  { %455 = vsyncpa [#allocation6], 1 }
 0x2e9   :  { %456 = vsyncpa [#allocation4], 1 }

</bundles_post_ra>
